<compile_context>
chip_gen: v5e
topology: v5e:2x2
jax: 0.10.0
libtpu: 0.0.40
codegen_flags: <defaults>
</compile_context>

<pallas_src>
import math

import jax
import jax.numpy as jnp
from jax.experimental import pallas as pl
from jax.experimental.pallas import tpu as pltpu

EPS = 1e-5


def _generator_kernel(x_ref,
                      w1_ref, g1_ref, be1_ref,
                      w2_ref, g2_ref, be2_ref,
                      w3_ref, g3_ref, be3_ref,
                      w4_hbm, g4_ref, be4_ref,
                      w5_hbm, b5_ref,
                      o_ref,
                      w4_buf, w5_buf, dma_sem):
    """Fused Linear->BN->ReLU x4 -> Linear->Sigmoid, all VMEM-resident."""
    # Kick off the two largest weight DMAs (HBM -> VMEM) immediately so they
    # overlap with layers 1-3 compute; wait right before their consumer.
    cp4 = pltpu.make_async_copy(w4_hbm, w4_buf, dma_sem.at[0])
    cp5 = pltpu.make_async_copy(w5_hbm, w5_buf, dma_sem.at[1])
    cp4.start()
    cp5.start()

    def linear_bn_relu(h, w_bf16, gamma_ref, beta_ref):
        # MXU: bf16 operands, f32 accumulation (bf16-native on v5e/v6e/v7x).
        y = jnp.dot(h.astype(jnp.bfloat16), w_bf16,
                    preferred_element_type=jnp.float32)            # MXU
        # Linear bias omitted: training-mode BN mean-subtraction cancels it.
        # One-pass batch statistics in f32 (biased variance), clamped >= 0.
        mean = jnp.mean(y, axis=0, keepdims=True)
        mean_sq = jnp.mean(y * y, axis=0, keepdims=True)
        var = jnp.maximum(mean_sq - mean * mean, 0.0)
        inv = jax.lax.rsqrt(var + EPS)                              # EUP
        # Fold gamma/beta into one per-feature scale/shift, fuse ReLU.
        scale = gamma_ref[...] * inv
        shift = beta_ref[...] - mean * scale
        return jnp.maximum(y * scale + shift, 0.0)                  # VPU

    h = x_ref[...].astype(jnp.float32)
    h = linear_bn_relu(h, w1_ref[...], g1_ref, be1_ref)
    h = linear_bn_relu(h, w2_ref[...], g2_ref, be2_ref)
    h = linear_bn_relu(h, w3_ref[...], g3_ref, be3_ref)
    cp4.wait()
    h = linear_bn_relu(h, w4_buf[...], g4_ref, be4_ref)
    cp5.wait()
    y = jnp.dot(h.astype(jnp.bfloat16), w5_buf[...],
                preferred_element_type=jnp.float32) + b5_ref[...]
    o_ref[...] = jax.nn.sigmoid(y).astype(o_ref.dtype)              # EUP


def generator_forward(params, noise):
    """One fused pallas_call for the whole generator forward pass."""
    (w1, _b1, g1, be1), (w2, _b2, g2, be2), (w3, _b3, g3, be3), \
        (w4, _b4, g4, be4), (w5, b5) = params

    noise = noise.astype(jnp.float32)
    B, noise_dim = noise.shape
    image_dim = w5.shape[1]
    dims = (noise_dim, w1.shape[1], w2.shape[1], w3.shape[1], w4.shape[1],
            image_dim)

    # Lane-dense output: pad final N to a multiple of 128; slice back after.
    n_pad = ((image_dim + 127) // 128) * 128
    if n_pad != image_dim:
        w5 = jnp.pad(w5, ((0, 0), (0, n_pad - image_dim)))
        b5 = jnp.pad(b5, ((0, 0), (0, n_pad - image_dim)))

    # ---- VMEM budgeting (resident footprint estimate, with headroom) ----
    maxdim = max(max(dims[1:5]), n_pad)
    w_bytes = (dims[0] * dims[1] + dims[1] * dims[2] + dims[2] * dims[3]
               + dims[3] * dims[4]) * 2 + dims[4] * n_pad * 2        # bf16
    small_bytes = 2 * sum(dims[1:5]) * 4 + n_pad * 4                 # gamma/beta/b5
    io_bytes = B * dims[0] * 4 + B * n_pad * 4                       # noise + out
    act_bytes = 6 * B * maxdim * 4                                   # live f32/bf16 slabs
    est_bytes = 2 * w_bytes + small_bytes + io_bytes + act_bytes + (4 << 20)
    if est_bytes > (48 << 20):
        # Stay well under v7x's 64 MiB physical VMEM per TensorCore.
        raise ValueError(
            f"Resident VMEM footprint ~{est_bytes >> 20} MiB exceeds the "
            "single-block budget; grid-tile the batch (requires two-pass / "
            "accumulated BN statistics).")
    vmem_limit = max(int(est_bytes), 32 << 20)

    # ---- Cost estimate so XLA can overlap this custom call ----
    flops = 2 * B * (dims[0] * dims[1] + dims[1] * dims[2] + dims[2] * dims[3]
                     + dims[3] * dims[4] + dims[4] * n_pad)
    transcend = B * n_pad + sum(dims[1:5])          # sigmoid + rsqrt
    bytes_accessed = io_bytes + w_bytes + small_bytes

    vmem = pl.BlockSpec(memory_space=pltpu.MemorySpace.VMEM)
    hbm = pl.BlockSpec(memory_space=pl.ANY)         # manual DMA inside kernel

    out = pl.pallas_call(
        _generator_kernel,
        out_shape=jax.ShapeDtypeStruct((B, n_pad), jnp.float32),
        in_specs=[vmem,                 # noise
                  vmem, vmem, vmem,     # w1, gamma1, beta1
                  vmem, vmem, vmem,     # w2, gamma2, beta2
                  vmem, vmem, vmem,     # w3, gamma3, beta3
                  hbm,  vmem, vmem,     # w4 (overlapped DMA), gamma4, beta4
                  hbm,  vmem],          # w5 (overlapped DMA), b5
        out_specs=vmem,
        scratch_shapes=[pltpu.VMEM(w4.shape, jnp.bfloat16),
                        pltpu.VMEM((dims[4], n_pad), jnp.bfloat16),
                        pltpu.SemaphoreType.DMA((2,))],
        compiler_params=pltpu.CompilerParams(vmem_limit_bytes=vmem_limit),
        cost_estimate=pl.CostEstimate(flops=int(flops),
                                      transcendentals=int(transcend),
                                      bytes_accessed=int(bytes_accessed)),
    )(noise,
      w1, g1, be1,
      w2, g2, be2,
      w3, g3, be3,
      w4, g4, be4,
      w5, b5)

    return out[:, :image_dim] if n_pad != image_dim else out


def init_generator_params(key, noise_dim, image_dim, hidden_dim):
    """PyTorch-style init: Linear U(+-1/sqrt(fan_in)), BN gamma=1, beta=0.

    Weights stored (in_features, out_features) in bf16 (MXU-native, halves the
    HBM->VMEM weight traffic); biases / gamma / beta kept in f32.
    """
    dims = [noise_dim, hidden_dim, hidden_dim * 2, hidden_dim * 4,
            hidden_dim * 8, image_dim]
    params = []
    for i in range(5):
        d_in, d_out = dims[i], dims[i + 1]
        key, kw, kb = jax.random.split(key, 3)
        bound = 1.0 / math.sqrt(d_in)
        w = jax.random.uniform(kw, (d_in, d_out), jnp.float32, -bound, bound)
        w = w.astype(jnp.bfloat16)
        b = jax.random.uniform(kb, (1, d_out), jnp.float32, -bound, bound)
        if i < 4:
            gamma = jnp.ones((1, d_out), jnp.float32)
            beta = jnp.zeros((1, d_out), jnp.float32)
            params.append((w, b, gamma, beta))
        else:
            params.append((w, b))
    return params


def generator_reference(params, noise):
    """Pure-JAX f32 reference matching the PyTorch module (incl. bias)."""
    x = noise.astype(jnp.float32)
    for (w, b, gamma, beta) in params[:4]:
        y = x @ w.astype(jnp.float32) + b
        mean = jnp.mean(y, axis=0, keepdims=True)
        var = jnp.mean(jnp.square(y - mean), axis=0, keepdims=True)
        y = (y - mean) * jax.lax.rsqrt(var + EPS)
        x = jnp.maximum(y * gamma + beta, 0.0)
    w, b = params[4]
    return jax.nn.sigmoid(x @ w.astype(jnp.float32) + b)


if __name__ == "__main__":
    # Small shapes consistent with the module's architecture.
    batch = 8           # f32 activations only need a multiple-of-8 batch
    noise_dim = 16
    hidden_dim = 32
    image_dim = 64

    key = jax.random.PRNGKey(0)
    key, k_noise, k_params = jax.random.split(key, 3)

    params = init_generator_params(k_params, noise_dim, image_dim, hidden_dim)
    noise = jax.random.normal(k_noise, (batch, noise_dim), jnp.float32)

    out = generator_forward(params, noise)
    out = jax.block_until_ready(out)

    assert out.shape == (batch, image_dim), out.shape
    assert bool(jnp.all(jnp.isfinite(out)))
    assert bool(jnp.all((out >= 0.0) & (out <= 1.0)))  # sigmoid output range

    # Reference uses the same (bf16-stored) weights upcast to f32, so the only
    # deltas are the in-kernel bf16 activation casts, one-pass variance, and
    # bias cancellation; a 1e-2 tolerance comfortably covers them.
    ref = generator_reference(params, noise)
    err = float(jnp.max(jnp.abs(out - ref)))
    assert err < 1e-2, err

    print("KERNEL_OK")
</pallas_src>

<mosaic_0001>
module attributes {stable_mosaic.version = 11 : i64} {
  func.func @_generator_kernel(%arg0: memref<8x16xf32, #tpu.memory_space<vmem>>, %arg1: memref<16x32xbf16, #tpu.memory_space<vmem>>, %arg2: memref<1x32xf32, #tpu.memory_space<vmem>>, %arg3: memref<1x32xf32, #tpu.memory_space<vmem>>, %arg4: memref<32x64xbf16, #tpu.memory_space<vmem>>, %arg5: memref<1x64xf32, #tpu.memory_space<vmem>>, %arg6: memref<1x64xf32, #tpu.memory_space<vmem>>, %arg7: memref<64x128xbf16, #tpu.memory_space<vmem>>, %arg8: memref<1x128xf32, #tpu.memory_space<vmem>>, %arg9: memref<1x128xf32, #tpu.memory_space<vmem>>, %arg10: memref<128x256xbf16, #tpu.memory_space<any>>, %arg11: memref<1x256xf32, #tpu.memory_space<vmem>>, %arg12: memref<1x256xf32, #tpu.memory_space<vmem>>, %arg13: memref<256x128xbf16, #tpu.memory_space<any>>, %arg14: memref<1x128xf32, #tpu.memory_space<vmem>>, %arg15: memref<8x128xf32, #tpu.memory_space<vmem>>, %arg16: memref<128x256xbf16, #tpu.memory_space<vmem>>, %arg17: memref<256x128xbf16, #tpu.memory_space<vmem>>, %arg18: memref<2x!tpu.dma_semaphore, #tpu.memory_space<semaphore_mem>>) attributes {dimension_semantics = [], scalar_prefetch = 0 : i64, scratch_operands = 3 : i64, tpu.core_type = #tpu.core_type<tc>} {
    %c0_i32 = arith.constant 0 : i32
    %0 = tpu.memref_slice %arg18[%c0_i32] : memref<2x!tpu.dma_semaphore, #tpu.memory_space<semaphore_mem>> -> memref<1x!tpu.dma_semaphore, #tpu.memory_space<semaphore_mem>>
    %1 = tpu.memref_squeeze %0 : memref<1x!tpu.dma_semaphore, #tpu.memory_space<semaphore_mem>> -> memref<!tpu.dma_semaphore, #tpu.memory_space<semaphore_mem>>
    tpu.enqueue_dma source(%arg10 : memref<128x256xbf16, #tpu.memory_space<any>>) target(%arg16 : memref<128x256xbf16, #tpu.memory_space<vmem>>) target_semaphore(%1 : memref<!tpu.dma_semaphore, #tpu.memory_space<semaphore_mem>>)
    %c1_i32 = arith.constant 1 : i32
    %2 = tpu.memref_slice %arg18[%c1_i32] : memref<2x!tpu.dma_semaphore, #tpu.memory_space<semaphore_mem>> -> memref<1x!tpu.dma_semaphore, #tpu.memory_space<semaphore_mem>>
    %3 = tpu.memref_squeeze %2 : memref<1x!tpu.dma_semaphore, #tpu.memory_space<semaphore_mem>> -> memref<!tpu.dma_semaphore, #tpu.memory_space<semaphore_mem>>
    tpu.enqueue_dma source(%arg13 : memref<256x128xbf16, #tpu.memory_space<any>>) target(%arg17 : memref<256x128xbf16, #tpu.memory_space<vmem>>) target_semaphore(%3 : memref<!tpu.dma_semaphore, #tpu.memory_space<semaphore_mem>>)
    %c0 = arith.constant 0 : index
    %c0_0 = arith.constant 0 : index
    %4 = vector.load %arg0[%c0, %c0_0] : memref<8x16xf32, #tpu.memory_space<vmem>>, vector<8x16xf32>
    %c0_1 = arith.constant 0 : index
    %c0_2 = arith.constant 0 : index
    %5 = vector.load %arg1[%c0_1, %c0_2] : memref<16x32xbf16, #tpu.memory_space<vmem>>, vector<16x32xbf16>
    %6 = arith.truncf %4 : vector<8x16xf32> to vector<8x16xbf16>
    %cst = arith.constant dense<0.000000e+00> : vector<8x32xf32>
    %7 = tpu.matmul %6, %5, %cst {dimension_numbers = #tpu.dot_dimension_numbers<[1], [0], [0], [1], [0, 0, 1, 1], [], []>} : vector<8x16xbf16>, vector<16x32xbf16>, vector<8x32xf32> -> vector<8x32xf32>
    %cst_3 = arith.constant dense<0.000000e+00> : vector<32xf32>
    %8 = vector.multi_reduction <add>, %7, %cst_3 [0] : vector<8x32xf32> to vector<32xf32>
    %9 = vector.shape_cast %8 : vector<32xf32> to vector<1x32xf32>
    %cst_4 = arith.constant 8.000000e+00 : f32
    %10 = vector.broadcast %cst_4 : f32 to vector<1x32xf32>
    %11 = arith.divf %9, %10 : vector<1x32xf32>
    %12 = arith.mulf %7, %7 : vector<8x32xf32>
    %cst_5 = arith.constant dense<0.000000e+00> : vector<32xf32>
    %13 = vector.multi_reduction <add>, %12, %cst_5 [0] : vector<8x32xf32> to vector<32xf32>
    %14 = vector.shape_cast %13 : vector<32xf32> to vector<1x32xf32>
    %cst_6 = arith.constant 8.000000e+00 : f32
    %15 = vector.broadcast %cst_6 : f32 to vector<1x32xf32>
    %16 = arith.divf %14, %15 : vector<1x32xf32>
    %17 = arith.mulf %11, %11 : vector<1x32xf32>
    %18 = arith.subf %16, %17 : vector<1x32xf32>
    %cst_7 = arith.constant 0.000000e+00 : f32
    %19 = vector.broadcast %cst_7 : f32 to vector<1x32xf32>
    %20 = arith.maximumf %18, %19 : vector<1x32xf32>
    %cst_8 = arith.constant 9.99999974E-6 : f32
    %21 = vector.broadcast %cst_8 : f32 to vector<1x32xf32>
    %22 = arith.addf %20, %21 : vector<1x32xf32>
    %23 = math.rsqrt %22 : vector<1x32xf32>
    %c0_9 = arith.constant 0 : index
    %c0_10 = arith.constant 0 : index
    %24 = vector.load %arg2[%c0_9, %c0_10] : memref<1x32xf32, #tpu.memory_space<vmem>>, vector<1x32xf32>
    %25 = arith.mulf %24, %23 : vector<1x32xf32>
    %c0_11 = arith.constant 0 : index
    %c0_12 = arith.constant 0 : index
    %26 = vector.load %arg3[%c0_11, %c0_12] : memref<1x32xf32, #tpu.memory_space<vmem>>, vector<1x32xf32>
    %27 = arith.mulf %11, %25 : vector<1x32xf32>
    %28 = arith.subf %26, %27 : vector<1x32xf32>
    %29 = vector.broadcast %25 : vector<1x32xf32> to vector<8x32xf32>
    %30 = arith.mulf %7, %29 : vector<8x32xf32>
    %31 = vector.broadcast %28 : vector<1x32xf32> to vector<8x32xf32>
    %32 = arith.addf %30, %31 : vector<8x32xf32>
    %cst_13 = arith.constant 0.000000e+00 : f32
    %33 = vector.broadcast %cst_13 : f32 to vector<8x32xf32>
    %34 = arith.maximumf %32, %33 : vector<8x32xf32>
    %c0_14 = arith.constant 0 : index
    %c0_15 = arith.constant 0 : index
    %35 = vector.load %arg4[%c0_14, %c0_15] : memref<32x64xbf16, #tpu.memory_space<vmem>>, vector<32x64xbf16>
    %36 = arith.truncf %34 : vector<8x32xf32> to vector<8x32xbf16>
    %cst_16 = arith.constant dense<0.000000e+00> : vector<8x64xf32>
    %37 = tpu.matmul %36, %35, %cst_16 {dimension_numbers = #tpu.dot_dimension_numbers<[1], [0], [0], [1], [0, 0, 1, 1], [], []>} : vector<8x32xbf16>, vector<32x64xbf16>, vector<8x64xf32> -> vector<8x64xf32>
    %cst_17 = arith.constant dense<0.000000e+00> : vector<64xf32>
    %38 = vector.multi_reduction <add>, %37, %cst_17 [0] : vector<8x64xf32> to vector<64xf32>
    %39 = vector.shape_cast %38 : vector<64xf32> to vector<1x64xf32>
    %cst_18 = arith.constant 8.000000e+00 : f32
    %40 = vector.broadcast %cst_18 : f32 to vector<1x64xf32>
    %41 = arith.divf %39, %40 : vector<1x64xf32>
    %42 = arith.mulf %37, %37 : vector<8x64xf32>
    %cst_19 = arith.constant dense<0.000000e+00> : vector<64xf32>
    %43 = vector.multi_reduction <add>, %42, %cst_19 [0] : vector<8x64xf32> to vector<64xf32>
    %44 = vector.shape_cast %43 : vector<64xf32> to vector<1x64xf32>
    %cst_20 = arith.constant 8.000000e+00 : f32
    %45 = vector.broadcast %cst_20 : f32 to vector<1x64xf32>
    %46 = arith.divf %44, %45 : vector<1x64xf32>
    %47 = arith.mulf %41, %41 : vector<1x64xf32>
    %48 = arith.subf %46, %47 : vector<1x64xf32>
    %cst_21 = arith.constant 0.000000e+00 : f32
    %49 = vector.broadcast %cst_21 : f32 to vector<1x64xf32>
    %50 = arith.maximumf %48, %49 : vector<1x64xf32>
    %cst_22 = arith.constant 9.99999974E-6 : f32
    %51 = vector.broadcast %cst_22 : f32 to vector<1x64xf32>
    %52 = arith.addf %50, %51 : vector<1x64xf32>
    %53 = math.rsqrt %52 : vector<1x64xf32>
    %c0_23 = arith.constant 0 : index
    %c0_24 = arith.constant 0 : index
    %54 = vector.load %arg5[%c0_23, %c0_24] : memref<1x64xf32, #tpu.memory_space<vmem>>, vector<1x64xf32>
    %55 = arith.mulf %54, %53 : vector<1x64xf32>
    %c0_25 = arith.constant 0 : index
    %c0_26 = arith.constant 0 : index
    %56 = vector.load %arg6[%c0_25, %c0_26] : memref<1x64xf32, #tpu.memory_space<vmem>>, vector<1x64xf32>
    %57 = arith.mulf %41, %55 : vector<1x64xf32>
    %58 = arith.subf %56, %57 : vector<1x64xf32>
    %59 = vector.broadcast %55 : vector<1x64xf32> to vector<8x64xf32>
    %60 = arith.mulf %37, %59 : vector<8x64xf32>
    %61 = vector.broadcast %58 : vector<1x64xf32> to vector<8x64xf32>
    %62 = arith.addf %60, %61 : vector<8x64xf32>
    %cst_27 = arith.constant 0.000000e+00 : f32
    %63 = vector.broadcast %cst_27 : f32 to vector<8x64xf32>
    %64 = arith.maximumf %62, %63 : vector<8x64xf32>
    %c0_28 = arith.constant 0 : index
    %c0_29 = arith.constant 0 : index
    %65 = vector.load %arg7[%c0_28, %c0_29] : memref<64x128xbf16, #tpu.memory_space<vmem>>, vector<64x128xbf16>
    %66 = arith.truncf %64 : vector<8x64xf32> to vector<8x64xbf16>
    %cst_30 = arith.constant dense<0.000000e+00> : vector<8x128xf32>
    %67 = tpu.matmul %66, %65, %cst_30 {dimension_numbers = #tpu.dot_dimension_numbers<[1], [0], [0], [1], [0, 0, 1, 1], [], []>} : vector<8x64xbf16>, vector<64x128xbf16>, vector<8x128xf32> -> vector<8x128xf32>
    %cst_31 = arith.constant dense<0.000000e+00> : vector<128xf32>
    %68 = vector.multi_reduction <add>, %67, %cst_31 [0] : vector<8x128xf32> to vector<128xf32>
    %69 = vector.shape_cast %68 : vector<128xf32> to vector<1x128xf32>
    %cst_32 = arith.constant 8.000000e+00 : f32
    %70 = vector.broadcast %cst_32 : f32 to vector<1x128xf32>
    %71 = arith.divf %69, %70 : vector<1x128xf32>
    %72 = arith.mulf %67, %67 : vector<8x128xf32>
    %cst_33 = arith.constant dense<0.000000e+00> : vector<128xf32>
    %73 = vector.multi_reduction <add>, %72, %cst_33 [0] : vector<8x128xf32> to vector<128xf32>
    %74 = vector.shape_cast %73 : vector<128xf32> to vector<1x128xf32>
    %cst_34 = arith.constant 8.000000e+00 : f32
    %75 = vector.broadcast %cst_34 : f32 to vector<1x128xf32>
    %76 = arith.divf %74, %75 : vector<1x128xf32>
    %77 = arith.mulf %71, %71 : vector<1x128xf32>
    %78 = arith.subf %76, %77 : vector<1x128xf32>
    %cst_35 = arith.constant 0.000000e+00 : f32
    %79 = vector.broadcast %cst_35 : f32 to vector<1x128xf32>
    %80 = arith.maximumf %78, %79 : vector<1x128xf32>
    %cst_36 = arith.constant 9.99999974E-6 : f32
    %81 = vector.broadcast %cst_36 : f32 to vector<1x128xf32>
    %82 = arith.addf %80, %81 : vector<1x128xf32>
    %83 = math.rsqrt %82 : vector<1x128xf32>
    %c0_37 = arith.constant 0 : index
    %c0_38 = arith.constant 0 : index
    %84 = vector.load %arg8[%c0_37, %c0_38] : memref<1x128xf32, #tpu.memory_space<vmem>>, vector<1x128xf32>
    %85 = arith.mulf %84, %83 : vector<1x128xf32>
    %c0_39 = arith.constant 0 : index
    %c0_40 = arith.constant 0 : index
    %86 = vector.load %arg9[%c0_39, %c0_40] : memref<1x128xf32, #tpu.memory_space<vmem>>, vector<1x128xf32>
    %87 = arith.mulf %71, %85 : vector<1x128xf32>
    %88 = arith.subf %86, %87 : vector<1x128xf32>
    %89 = vector.broadcast %85 : vector<1x128xf32> to vector<8x128xf32>
    %90 = arith.mulf %67, %89 : vector<8x128xf32>
    %91 = vector.broadcast %88 : vector<1x128xf32> to vector<8x128xf32>
    %92 = arith.addf %90, %91 : vector<8x128xf32>
    %cst_41 = arith.constant 0.000000e+00 : f32
    %93 = vector.broadcast %cst_41 : f32 to vector<8x128xf32>
    %94 = arith.maximumf %92, %93 : vector<8x128xf32>
    %c0_i32_42 = arith.constant 0 : i32
    %95 = tpu.memref_slice %arg18[%c0_i32_42] : memref<2x!tpu.dma_semaphore, #tpu.memory_space<semaphore_mem>> -> memref<1x!tpu.dma_semaphore, #tpu.memory_space<semaphore_mem>>
    %96 = tpu.memref_squeeze %95 : memref<1x!tpu.dma_semaphore, #tpu.memory_space<semaphore_mem>> -> memref<!tpu.dma_semaphore, #tpu.memory_space<semaphore_mem>>
    tpu.wait_dma2 semaphore(%96 : memref<!tpu.dma_semaphore, #tpu.memory_space<semaphore_mem>>) src(%arg10 : memref<128x256xbf16, #tpu.memory_space<any>>) dst(%arg16 : memref<128x256xbf16, #tpu.memory_space<vmem>>)
    %c0_43 = arith.constant 0 : index
    %c0_44 = arith.constant 0 : index
    %97 = vector.load %arg16[%c0_43, %c0_44] : memref<128x256xbf16, #tpu.memory_space<vmem>>, vector<128x256xbf16>
    %98 = arith.truncf %94 : vector<8x128xf32> to vector<8x128xbf16>
    %cst_45 = arith.constant dense<0.000000e+00> : vector<8x256xf32>
    %99 = tpu.matmul %98, %97, %cst_45 {dimension_numbers = #tpu.dot_dimension_numbers<[1], [0], [0], [1], [0, 0, 1, 1], [], []>} : vector<8x128xbf16>, vector<128x256xbf16>, vector<8x256xf32> -> vector<8x256xf32>
    %cst_46 = arith.constant dense<0.000000e+00> : vector<256xf32>
    %100 = vector.multi_reduction <add>, %99, %cst_46 [0] : vector<8x256xf32> to vector<256xf32>
    %101 = vector.shape_cast %100 : vector<256xf32> to vector<1x256xf32>
    %cst_47 = arith.constant 8.000000e+00 : f32
    %102 = vector.broadcast %cst_47 : f32 to vector<1x256xf32>
    %103 = arith.divf %101, %102 : vector<1x256xf32>
    %104 = arith.mulf %99, %99 : vector<8x256xf32>
    %cst_48 = arith.constant dense<0.000000e+00> : vector<256xf32>
    %105 = vector.multi_reduction <add>, %104, %cst_48 [0] : vector<8x256xf32> to vector<256xf32>
    %106 = vector.shape_cast %105 : vector<256xf32> to vector<1x256xf32>
    %cst_49 = arith.constant 8.000000e+00 : f32
    %107 = vector.broadcast %cst_49 : f32 to vector<1x256xf32>
    %108 = arith.divf %106, %107 : vector<1x256xf32>
    %109 = arith.mulf %103, %103 : vector<1x256xf32>
    %110 = arith.subf %108, %109 : vector<1x256xf32>
    %cst_50 = arith.constant 0.000000e+00 : f32
    %111 = vector.broadcast %cst_50 : f32 to vector<1x256xf32>
    %112 = arith.maximumf %110, %111 : vector<1x256xf32>
    %cst_51 = arith.constant 9.99999974E-6 : f32
    %113 = vector.broadcast %cst_51 : f32 to vector<1x256xf32>
    %114 = arith.addf %112, %113 : vector<1x256xf32>
    %115 = math.rsqrt %114 : vector<1x256xf32>
    %c0_52 = arith.constant 0 : index
    %c0_53 = arith.constant 0 : index
    %116 = vector.load %arg11[%c0_52, %c0_53] : memref<1x256xf32, #tpu.memory_space<vmem>>, vector<1x256xf32>
    %117 = arith.mulf %116, %115 : vector<1x256xf32>
    %c0_54 = arith.constant 0 : index
    %c0_55 = arith.constant 0 : index
    %118 = vector.load %arg12[%c0_54, %c0_55] : memref<1x256xf32, #tpu.memory_space<vmem>>, vector<1x256xf32>
    %119 = arith.mulf %103, %117 : vector<1x256xf32>
    %120 = arith.subf %118, %119 : vector<1x256xf32>
    %121 = vector.broadcast %117 : vector<1x256xf32> to vector<8x256xf32>
    %122 = arith.mulf %99, %121 : vector<8x256xf32>
    %123 = vector.broadcast %120 : vector<1x256xf32> to vector<8x256xf32>
    %124 = arith.addf %122, %123 : vector<8x256xf32>
    %cst_56 = arith.constant 0.000000e+00 : f32
    %125 = vector.broadcast %cst_56 : f32 to vector<8x256xf32>
    %126 = arith.maximumf %124, %125 : vector<8x256xf32>
    %c1_i32_57 = arith.constant 1 : i32
    %127 = tpu.memref_slice %arg18[%c1_i32_57] : memref<2x!tpu.dma_semaphore, #tpu.memory_space<semaphore_mem>> -> memref<1x!tpu.dma_semaphore, #tpu.memory_space<semaphore_mem>>
    %128 = tpu.memref_squeeze %127 : memref<1x!tpu.dma_semaphore, #tpu.memory_space<semaphore_mem>> -> memref<!tpu.dma_semaphore, #tpu.memory_space<semaphore_mem>>
    tpu.wait_dma2 semaphore(%128 : memref<!tpu.dma_semaphore, #tpu.memory_space<semaphore_mem>>) src(%arg13 : memref<256x128xbf16, #tpu.memory_space<any>>) dst(%arg17 : memref<256x128xbf16, #tpu.memory_space<vmem>>)
    %129 = arith.truncf %126 : vector<8x256xf32> to vector<8x256xbf16>
    %c0_58 = arith.constant 0 : index
    %c0_59 = arith.constant 0 : index
    %130 = vector.load %arg17[%c0_58, %c0_59] : memref<256x128xbf16, #tpu.memory_space<vmem>>, vector<256x128xbf16>
    %cst_60 = arith.constant dense<0.000000e+00> : vector<8x128xf32>
    %131 = tpu.matmul %129, %130, %cst_60 {dimension_numbers = #tpu.dot_dimension_numbers<[1], [0], [0], [1], [0, 0, 1, 1], [], []>} : vector<8x256xbf16>, vector<256x128xbf16>, vector<8x128xf32> -> vector<8x128xf32>
    %c0_61 = arith.constant 0 : index
    %c0_62 = arith.constant 0 : index
    %132 = vector.load %arg14[%c0_61, %c0_62] : memref<1x128xf32, #tpu.memory_space<vmem>>, vector<1x128xf32>
    %133 = vector.broadcast %132 : vector<1x128xf32> to vector<8x128xf32>
    %134 = arith.addf %131, %133 : vector<8x128xf32>
    %135 = arith.negf %134 : vector<8x128xf32>
    %136 = math.exp %135 : vector<8x128xf32>
    %cst_63 = arith.constant 1.000000e+00 : f32
    %137 = vector.broadcast %cst_63 : f32 to vector<8x128xf32>
    %138 = arith.addf %137, %136 : vector<8x128xf32>
    %139 = arith.divf %137, %138 : vector<8x128xf32>
    %c0_64 = arith.constant 0 : index
    %c0_65 = arith.constant 0 : index
    %140 = vector.load %arg15[%c0_64, %c0_65] : memref<8x128xf32, #tpu.memory_space<vmem>>, vector<8x128xf32>
    tpu.vector_store %arg15[%c0_64, %c0_65], %139 {strides = array<i32>} : memref<8x128xf32, #tpu.memory_space<vmem>>, vector<8x128xf32>,
    return
  }
}

</mosaic_0001>

<bundles_post_ra>
// kernel: tpu_custom_call.1
= control target key start
LH: loop header
LB: loop body
LE: loop exit
PB: predicated region body
PF: predicated region fallthrough
CT: control target
= control target key end

     0   :  { %20 = vsyncpa [#allocation6], 0  ;;  %s1535_s0 = inlined_call_operand.hbm [shape: f32[8,16], index: 0, kind: input, shape index: {}]   ;;  %s1536_s1 = inlined_call_operand.hbm [shape: bf16[16,32], index: 1, kind: input, shape index: {}]   ;;  %s1537_s2 = inlined_call_operand.hbm [shape: f32[1,32], index: 2, kind: input, shape index: {}]   ;;  %s1538_s3 = inlined_call_operand.hbm [shape: f32[1,32], index: 3, kind: input, shape index: {}]   ;;  %s1539_s4 = inlined_call_operand.hbm [shape: bf16[32,64], index: 4, kind: input, shape index: {}]   ;;  %s1540_s5 = inlined_call_operand.hbm [shape: f32[1,64], index: 5, kind: input, shape index: {}]   ;;  %s1541_s6 = inlined_call_operand.vmem [shape: f32[1,64], index: 6, kind: input, shape index: {}]   ;;  %s1542_s7 = inlined_call_operand.hbm [shape: bf16[64,128], index: 7, kind: input, shape index: {}]   ;;  %s1543_s8 = inlined_call_operand.vmem [shape: f32[1,128], index: 8, kind: input, shape index: {}]   ;;  %s1544_s9 = inlined_call_operand.vmem [shape: f32[1,128], index: 9, kind: input, shape index: {}]   ;;  %s1545_s10 = inlined_call_operand.hbm [shape: bf16[128,256], index: 10, kind: input, shape index: {}]   ;;  %s1546_s11 = inlined_call_operand.vmem [shape: f32[1,256], index: 11, kind: input, shape index: {}]   ;;  %s1547_s12 = inlined_call_operand.vmem [shape: f32[1,256], index: 12, kind: input, shape index: {}]   ;;  %s1548_s13 = inlined_call_operand.hbm [shape: bf16[256,128], index: 13, kind: input, shape index: {}]   ;;  %s1549_s14 = inlined_call_operand.vmem [shape: f32[1,128], index: 14, kind: input, shape index: {}]   ;;  %s1550_s15 = inlined_call_operand.hbm [shape: f32[8,128], index: 15, kind: output, shape index: {}]  }
   0x1   :  { %21 = vsyncpa [#allocation9], 0 }
   0x2   :  { %22 = vsyncpa [#allocation12], 0 }
   0x3   :  { %23 = vsyncpa [#allocation15], 0  ;;  %s40_s20 = sshll.u32 %s1536_s1, 4  ;;  %s41_s20 = int_to_ptr.hbm [resolvable:$true] %s40_s20 }
   0x4   :  { %24 = vsyncpa [#allocation7], 0  ;;  %s1347_s21 = smov [#allocation8]   ;;  %s65_s25 = sshll.u32 %s1538_s3, 4  ;;  %s66_s25 = int_to_ptr.hbm [resolvable:$true] %s65_s25 }
   0x5   :  { %s42_s22 = sshll.u32 %s1347_s21, 4  ;;  %s1348_s26 = smov 64   ;;  %s43_s22 = int_to_ptr.vmem [resolvable:$true] %s42_s22 }
   0x6   :  { %s1349_s27 = smov 4   ;;  %s1350_s28 = smov [#allocation11]  }
   0x7   :  { %48 = dma.hbm_to_vmem [thread:$0]  %s41_s20, 128, %s43_s22, [#allocation9], %s1348_s26, %s1348_s26, %s1349_s27  }
   0x8   :  { %s67_s29 = sshll.u32 %s1350_s28, 4  ;;  %s89_s16 = sshll.u32 %s1540_s5, 4  ;;  %s68_s29 = int_to_ptr.vmem [resolvable:$true] %s67_s29  ;;  %s90_s16 = int_to_ptr.hbm [resolvable:$true] %s89_s16 }
   0x9   :  { %70 = dma.hbm_to_vmem [thread:$0]  %s66_s25, 16, %s68_s29, [#allocation12]  }
   0xa   :  { %s30_s3 = sshll.u32 %s1535_s0, 4  ;;  %s1351_s19 = smov [#allocation14]   ;;  %s31_s3 = int_to_ptr.hbm [resolvable:$true] %s30_s3 }
   0xb   :  { %s91_s21 = sshll.u32 %s1351_s19, 4  ;;  %s1352_s20 = smov [#allocation5]   ;;  %s92_s21 = int_to_ptr.vmem [resolvable:$true] %s91_s21 }
   0xc   :  { %94 = dma.hbm_to_vmem [thread:$0]  %s90_s16, 16, %s92_s21, [#allocation15]  }
   0xd   :  { %s32_s22 = sshll.u32 %s1352_s20, 4  ;;  %s54_s28 = sshll.u32 %s1537_s2, 4  ;;  %s33_s22 = int_to_ptr.vmem [resolvable:$true] %s32_s22  ;;  %s55_s28 = int_to_ptr.hbm [resolvable:$true] %s54_s28 }
   0xe   :  { %35 = dma.hbm_to_vmem [thread:$0]  %s31_s3, 128, %s33_s22, [#allocation6]  }
   0xf   :  { %s75_s29 = sshll.u32 %s1539_s4, 4  ;;  %s1353_s30 = smov [#allocation10]   ;;  %s76_s29 = int_to_ptr.hbm [resolvable:$true] %s75_s29 }
  0x10   :  { %s56_s0 = sshll.u32 %s1353_s30, 4  ;;  %s1354_s1 = smov [#allocation13]   ;;  %s57_s0 = int_to_ptr.vmem [resolvable:$true] %s56_s0 }
  0x11   :  { %59 = dma.hbm_to_vmem [thread:$0]  %s55_s28, 16, %s57_s0, [#allocation9]  }
  0x12   :  { %s77_s16 = sshll.u32 %s1354_s1, 4  ;;  %s101_s19 = sshll.u32 %s1542_s7, 4  ;;  %s78_s16 = int_to_ptr.vmem [resolvable:$true] %s77_s16  ;;  %s102_s19 = int_to_ptr.hbm [resolvable:$true] %s101_s19 }
  0x13   :  { %83 = dma.hbm_to_vmem [thread:$0]  %s76_s29, 256, %s78_s16, [#allocation12], %s1348_s26, %s1348_s26, %s1349_s27  }
  0x14   :  { %s1355_s2 = smov [#allocation16]  }
  0x15   :  { %s103_s3 = sshll.u32 %s1355_s2, 4  ;;  %s104_s3 = int_to_ptr.vmem [resolvable:$true] %s103_s3 }
  0x16   :  { %109 = dma.hbm_to_vmem [thread:$0]  %s102_s19, 512, %s104_s3, [#allocation15], %s1348_s26, %s1348_s26, %s1349_s27  }
  0x17   :  { %1333 = dma.done.wait [#allocation6], 128  }
  0x18   :  { %1334 = vsyncadd [#allocation6], 4294967168 }
  0x19   :  { %1335 = dma.done.wait [#allocation9], 144  }
  0x1a   :  { %1336 = vsyncadd [#allocation9], 4294967152 }
  0x1b   :  { %1337 = dma.done.wait [#allocation12], 272  }
  0x1c   :  { %1338 = vsyncadd [#allocation12], 4294967024 }
  0x1d   :  { %1339 = dma.done.wait [#allocation15], 528  }
  0x1e   :  { %1340 = vsyncadd [#allocation15], 4294966768  ;;  %v1024_v0 = vld [vmem:[#allocation8] sm:$0xff]  ;;  %v176_v1 = vld [vmem:[#allocation5] sm:$0xff]  ;;  %vm186_vm0 = vcmask 130048   ;;  %v1356_v5 = vmov 8.0  }
  0x1f   :  { %v179_v2 = vpack.c.bf16 %v176_v1, %v176_v1  ;;  %197 = vmatpush.bf16.msra.mxu0 %v1024_v0  ;;  %v1026_v3 = vld [vmem:[#allocation13 + $0x8] sm:$0xff]  ;;  %v1025_v4 = vld [vmem:[#allocation13] sm:$0xff]  ;;  %1076 = vrcp.f32 %v1356_v5  ;;  %vm203_vm1 = vcmask 261120   ;;  %v242_v41 = vld [vmem:[#allocation10] sm:$0x1]  ;;  %vm289_vm6 = vcmask 523264  }
  0x20   :  { %282 = vmatpush.bf16.msra.mxu1 %v1026_v3  ;;  %v244_v44 = vld [vmem:[#allocation11] sm:$0x1]  ;;  %v1030_v53 = vld [vmem:[#allocation16 + $0x18] sm:$0xff]  ;;  %v1029_v54 = vld [vmem:[#allocation16 + $0x10] sm:$0xff]  ;;  %s156_s21 = sshll.u32 %s1545_s10, 4  ;;  %s1357_s20 = smov [#allocation2]   ;;  %s157_s21 = int_to_ptr.hbm [resolvable:$true] %s156_s21 }
  0x21   :  { %375 = vmatpush.bf16.msra.mxu2 %v1030_v53  ;;  %v1028_v55 = vld [vmem:[#allocation16 + $0x8] sm:$0xff]  ;;  %v1027_v56 = vld [vmem:[#allocation16] sm:$0xff]  ;;  %s158_s22 = sshll.u32 %s1357_s20, 4  ;;  %s170_s24 = sshll.u32 %s1548_s13, 4  ;;  %s159_s22 = int_to_ptr.vmem [resolvable:$true] %s158_s22  ;;  %s171_s24 = int_to_ptr.hbm [resolvable:$true] %s170_s24 }
  0x22   :  { %866 = vmatmul.msk.bf16.vlgmr.msra.gmra.mxu0 %vm186_vm0, %v179_v2  ;;  %161 = dma.hbm_to_vmem [thread:$0]  %s157_s21, 2048, %s159_s22, [#allocation4] }
  0x23   :  { %s1358_s28 = smov [#allocation3]  }
  0x24   :  { %283 = vmatpush.bf16.msra.mxu1 %v1025_v4  ;;  %s172_s5 = sshll.u32 %s1358_s28, 4  ;;  %s173_s5 = int_to_ptr.vmem [resolvable:$true] %s172_s5 }
  0x25   :  { %v1077_v6 = vpop.eup %1076  ;;  %376 = vmatpush.bf16.msra.mxu2 %v1029_v54  ;;  %175 = dma.hbm_to_vmem [thread:$0]  %s171_s24, 2048, %s173_s5, [#allocation4 + $0x1] }
  0x26   :  { %v212_v7 = vmul.f32 8.0, %v1077_v6  ;;  %vm216_vm2 = vweird.f32 %v1077_v6 }
  0x28   :  { %v213_v8 = vsub.f32 1.0, %v212_v7 }
  0x29   :  { %377 = vmatpush.bf16.msra.mxu2 %v1028_v55 }
  0x2a   :  { %v214_v13 = vmul.f32 %v1077_v6, %v213_v8 }
  0x2c   :  { %v215_v19 = vadd.f32 %v1077_v6, %v214_v13 }
  0x2d   :  { %378 = vmatpush.bf16.msra.mxu2 %v1027_v56 }
  0x2e   :  { %v1472_v25 = vsel %vm216_vm2, %v1077_v6, %v215_v19 }
  0x9f   :  { %v199_v9 = vpop.f32.mrf.mxu0 }
  0xa0   :  { %v219_v10 = vmul.f32 %v199_v9, %v199_v9  ;;  %v204_v11 = vsel %vm203_vm1, %v199_v9, 0.0 }
  0xa1   :  { %v205_v12 = vrot.slane %v204_v11, 4 }
  0xa2   :  { %v220_v14 = vsel %vm203_vm1, %v219_v10, 0.0 }
  0xa3   :  { %v206_v15 = vadd.f32 %v205_v12, %v204_v11  ;;  %v221_v16 = vrot.slane %v220_v14, 4 }
  0xa5   :  { %v207_v17 = vrot.slane %v206_v15, 2  ;;  %v222_v18 = vadd.f32 %v221_v16, %v220_v14 }
  0xa7   :  { %v201_v20 = vpop.f32.mrf.mxu0  ;;  %v208_v21 = vadd.f32 %v207_v17, %v206_v15  ;;  %v223_v22 = vrot.slane %v222_v18, 2 }
  0xa9   :  { %v209_v23 = vrot.slane %v208_v21, 1  ;;  %v224_v24 = vadd.f32 %v223_v22, %v222_v18  ;;  %v321_v22 = vld [vmem:[#allocation14] sm:$0x1] }
  0xab   :  { %v210_v26 = vadd.f32 %v209_v23, %v208_v21  ;;  %v225_v27 = vrot.slane %v224_v24, 1 }
  0xad   :  { %v218_v28 = vmul.f32 %v1472_v25, %v210_v26  ;;  %v226_v29 = vadd.f32 %v225_v27, %v224_v24  ;;  %v323_v26 = vld [vmem:[%s1541_s6] sm:$0x1] }
  0xaf   :  { %v227_v30 = vmul.f32 %v226_v29, %v1472_v25  ;;  %v228_v31 = vmul.f32 %v218_v28, %v218_v28 }
  0xb1   :  { %v229_v32 = vsub.f32 %v227_v30, %v228_v31 }
  0xb3   :  { %v230_v33 = vmax.f32 %v229_v32, 0.0 }
  0xb5   :  { %v231_v34 = vadd.f32 1e-05, %v230_v33 }
  0xb7   :  { %1078 = vrsqrt.f32 %v231_v34  ;;  %vm238_vm4 = vweird.f32 %v231_v34 }
  0xbd   :  { %v1079_v35 = vpop.eup %1078 }
  0xbe   :  { %v233_v36 = vmul.f32 %v1079_v35, %v231_v34  ;;  %vm239_vm3 = vweird.f32 %v1079_v35 }
  0xbf   :  { %vm240_vm5 = vmor %vm238_vm4, %vm239_vm3 }
  0xc0   :  { %v234_v37 = vmul.f32 %v1079_v35, %v233_v36 }
  0xc2   :  { %v235_v38 = vmul.f32 0.5, %v234_v37 }
  0xc4   :  { %v236_v39 = vsub.f32 1.5, %v235_v38 }
  0xc6   :  { %v237_v40 = vmul.f32 %v1079_v35, %v236_v39 }
  0xc8   :  { %v241_v42 = vsel %vm240_vm5, %v1079_v35, %v237_v40 }
  0xc9   :  { %v243_v43 = vmul.f32 %v242_v41, %v241_v42 }
  0xcb   :  { %v245_v45 = vmul.f32 %v243_v43, %v218_v28  ;;  %v248_v46 = vperm.slane %v243_v43, 0 }
  0xcd   :  { %v246_v47 = vsub.f32 %v244_v44, %v245_v45  ;;  %v250_v48 = vmul.f32 %v248_v46, %v199_v9 }
  0xcf   :  { %v252_v49 = vperm.slane %v246_v47, 0 }
  0xd1   :  { %v254_v50 = vadd.f32 %v252_v49, %v250_v48 }
  0xd3   :  { %v255_v51 = vmax.f32 %v254_v50, 0.0 }
  0xd5   :  { %v260_v52 = vpack.c.bf16 %v255_v51, %v255_v51 }
  0xd7   :  { %875 = vmatmul.msk.bf16.vlgmr.msra.gmra.mxu1 %vm203_vm1, %v260_v52 }
 0x154   :  { %v285_v57 = vpop.f32.mrf.mxu1 }
 0x155   :  { %v298_v58 = vmul.f32 %v285_v57, %v285_v57  ;;  %v290_v59 = vsel %vm289_vm6, %v285_v57, 0.0 }
 0x156   :  { %v291_v60 = vrot.slane %v290_v59, 4 }
 0x157   :  { %v299_v61 = vsel %vm289_vm6, %v298_v58, 0.0 }
 0x158   :  { %v292_v62 = vadd.f32 %v291_v60, %v290_v59  ;;  %v300_v63 = vrot.slane %v299_v61, 4 }
 0x15a   :  { %v293_v0 = vrot.slane %v292_v62, 2  ;;  %v301_v1 = vadd.f32 %v300_v63, %v299_v61 }
 0x15c   :  { %v287_v2 = vpop.f32.mrf.mxu1  ;;  %v294_v3 = vadd.f32 %v293_v0, %v292_v62  ;;  %v302_v4 = vrot.slane %v301_v1, 2  ;;  %v413_v62 = vld [vmem:[%s1543_s8] sm:$0x1] }
 0x15e   :  { %v295_v5 = vrot.slane %v294_v3, 1  ;;  %v303_v6 = vadd.f32 %v302_v4, %v301_v1  ;;  %v415_v1 = vld [vmem:[%s1544_s9] sm:$0x1] }
 0x160   :  { %v296_v7 = vadd.f32 %v295_v5, %v294_v3  ;;  %v304_v8 = vrot.slane %v303_v6, 1 }
 0x162   :  { %v297_v9 = vmul.f32 %v296_v7, %v1472_v25  ;;  %v305_v10 = vadd.f32 %v304_v8, %v303_v6 }
 0x164   :  { %v306_v11 = vmul.f32 %v305_v10, %v1472_v25  ;;  %v307_v12 = vmul.f32 %v297_v9, %v297_v9 }
 0x166   :  { %v308_v13 = vsub.f32 %v306_v11, %v307_v12 }
 0x168   :  { %v309_v14 = vmax.f32 %v308_v13, 0.0 }
 0x16a   :  { %v310_v15 = vadd.f32 1e-05, %v309_v14 }
 0x16c   :  { %1080 = vrsqrt.f32 %v310_v15  ;;  %vm317_vm8 = vweird.f32 %v310_v15 }
 0x172   :  { %v1081_v16 = vpop.eup %1080 }
 0x173   :  { %v312_v17 = vmul.f32 %v1081_v16, %v310_v15  ;;  %vm318_vm7 = vweird.f32 %v1081_v16 }
 0x174   :  { %vm319_vm9 = vmor %vm317_vm8, %vm318_vm7 }
 0x175   :  { %v313_v18 = vmul.f32 %v1081_v16, %v312_v17 }
 0x177   :  { %v314_v19 = vmul.f32 0.5, %v313_v18 }
 0x179   :  { %v315_v20 = vsub.f32 1.5, %v314_v19 }
 0x17b   :  { %v316_v21 = vmul.f32 %v1081_v16, %v315_v20 }
 0x17d   :  { %v320_v23 = vsel %vm319_vm9, %v1081_v16, %v316_v21 }
 0x17e   :  { %v322_v24 = vmul.f32 %v321_v22, %v320_v23 }
 0x180   :  { %v324_v27 = vmul.f32 %v322_v24, %v297_v9  ;;  %v327_v28 = vperm.slane %v322_v24, 0 }
 0x182   :  { %v325_v29 = vsub.f32 %v323_v26, %v324_v27  ;;  %v329_v30 = vmul.f32 %v327_v28, %v285_v57 }
 0x184   :  { %v331_v31 = vperm.slane %v325_v29, 0 }
 0x186   :  { %v333_v32 = vadd.f32 %v331_v31, %v329_v30 }
 0x188   :  { %v334_v33 = vmax.f32 %v333_v32, 0.0 }
 0x18a   :  { %v343_v34 = vpack.c.bf16 %v334_v33, %v334_v33 }
 0x18c   :  { %892 = vmatmul.msk.bf16.vlgmr.msra.gmra.mxu2 %vm289_vm6, %v343_v34 }
 0x20f   :  { %v380_v35 = vpop.f32.mrf.mxu2 }
 0x210   :  { %v384_v36 = vrot.slane %v380_v35, 4  ;;  %v391_v37 = vmul.f32 %v380_v35, %v380_v35 }
 0x212   :  { %v385_v38 = vadd.f32 %v384_v36, %v380_v35  ;;  %v392_v39 = vrot.slane %v391_v37, 4 }
 0x214   :  { %v386_v40 = vrot.slane %v385_v38, 2  ;;  %v393_v41 = vadd.f32 %v392_v39, %v391_v37 }
 0x216   :  { %v387_v42 = vadd.f32 %v386_v40, %v385_v38  ;;  %v394_v43 = vrot.slane %v393_v41, 2 }
 0x217   :  { %v382_v44 = vpop.f32.mrf.mxu2 }
 0x218   :  { %v388_v45 = vrot.slane %v387_v42, 1  ;;  %v395_v46 = vadd.f32 %v394_v43, %v393_v41 }
 0x21a   :  { %v389_v47 = vadd.f32 %v388_v45, %v387_v42  ;;  %v396_v48 = vrot.slane %v395_v46, 1 }
 0x21c   :  { %v390_v49 = vmul.f32 %v389_v47, %v1472_v25  ;;  %v397_v50 = vadd.f32 %v396_v48, %v395_v46 }
 0x21e   :  { %v398_v51 = vmul.f32 %v397_v50, %v1472_v25  ;;  %v399_v52 = vmul.f32 %v390_v49, %v390_v49 }
 0x220   :  { %v400_v53 = vsub.f32 %v398_v51, %v399_v52 }
 0x222   :  { %v401_v54 = vmax.f32 %v400_v53, 0.0 }
 0x224   :  { %v402_v55 = vadd.f32 1e-05, %v401_v54 }
 0x226   :  { %1082 = vrsqrt.f32 %v402_v55  ;;  %vm409_vm11 = vweird.f32 %v402_v55 }
 0x22c   :  { %v1083_v56 = vpop.eup %1082 }
 0x22d   :  { %v404_v57 = vmul.f32 %v1083_v56, %v402_v55  ;;  %vm410_vm10 = vweird.f32 %v1083_v56 }
 0x22e   :  { %vm411_vm12 = vmor %vm409_vm11, %vm410_vm10 }
 0x22f   :  { %v405_v58 = vmul.f32 %v1083_v56, %v404_v57 }
 0x231   :  { %v406_v59 = vmul.f32 0.5, %v405_v58 }
 0x233   :  { %v407_v60 = vsub.f32 1.5, %v406_v59 }
 0x235   :  { %v408_v61 = vmul.f32 %v1083_v56, %v407_v60 }
 0x237   :  { %v412_v63 = vsel %vm411_vm12, %v1083_v56, %v408_v61 }
 0x238   :  { %v414_v0 = vmul.f32 %v413_v62, %v412_v63 }
 0x23a   :  { %v416_v2 = vmul.f32 %v414_v0, %v390_v49  ;;  %v419_v3 = vperm.slane %v414_v0, 0 }
 0x23c   :  { %v417_v4 = vsub.f32 %v415_v1, %v416_v2  ;;  %v421_v5 = vmul.f32 %v419_v3, %v380_v35 }
 0x23e   :  { %v423_v6 = vperm.slane %v417_v4, 0 }
 0x240   :  { %v1499_v7 = vadd.f32 %v423_v6, %v421_v5 }
 0x242   :  { %v426_v8 = vmax.f32 %v1499_v7, 0.0 }
 0x243   :  { %1341 = dma.done.wait [#allocation4], 2048 }
 0x244   :  { %1342 = vsyncadd [#allocation4], 4294965248  ;;  %v951_v9 = vld [vmem:[#allocation2 + $0x70] sm:$0xf]  ;;  %v1046_v10 = vld [vmem:[#allocation2 + $0x74] sm:$0xf0]  ;;  %v447_v58 = vpack.c.bf16 %v426_v8, %v426_v8 }
 0x245   :  { %v1045_v11 = vld [vmem:[#allocation2 + $0x74] sm:$0xf]  ;;  %v952_v12 = vor.u32 %v1046_v10, %v951_v9  ;;  %v953_v13 = vld [vmem:[#allocation2 + $0x78] sm:$0xf0]  ;;  %v943_v14 = vld [vmem:[#allocation2 + $0x60] sm:$0xf] }
 0x246   :  { %v1044_v15 = vld [vmem:[#allocation2 + $0x64] sm:$0xf0]  ;;  %v956_v16 = vor.u32 %v1045_v11, %v953_v13  ;;  %v1043_v17 = vld [vmem:[#allocation2 + $0x64] sm:$0xf]  ;;  %v945_v18 = vld [vmem:[#allocation2 + $0x68] sm:$0xf0] }
 0x247   :  { %528 = vmatpush.bf16.msra.mxu3 %v952_v12  ;;  %v944_v19 = vor.u32 %v1044_v15, %v943_v14  ;;  %v948_v20 = vor.u32 %v1043_v17, %v945_v18  ;;  %v935_v21 = vld [vmem:[#allocation2 + $0x50] sm:$0xf]  ;;  %v1042_v22 = vld [vmem:[#allocation2 + $0x54] sm:$0xf0]  ;;  %v1041_v23 = vld [vmem:[#allocation2 + $0x54] sm:$0xf] }
 0x248   :  { %541 = vmatpush.bf16.msrb.mxu0 %v956_v16  ;;  %v937_v24 = vld [vmem:[#allocation2 + $0x58] sm:$0xf0]  ;;  %v936_v26 = vor.u32 %v1042_v22, %v935_v21  ;;  %v927_v28 = vld [vmem:[#allocation2 + $0x40] sm:$0xf]  ;;  %v1040_v29 = vld [vmem:[#allocation2 + $0x44] sm:$0xf0] }
 0x249   :  { %v940_v27 = vor.u32 %v1041_v23, %v937_v24  ;;  %v1039_v30 = vld [vmem:[#allocation2 + $0x44] sm:$0xf]  ;;  %v929_v31 = vld [vmem:[#allocation2 + $0x48] sm:$0xf0]  ;;  %v928_v32 = vor.u32 %v1040_v29, %v927_v28  ;;  %v919_v34 = vld [vmem:[#allocation2 + $0x30] sm:$0xf] }
 0x24a   :  { %v932_v33 = vor.u32 %v1039_v30, %v929_v31  ;;  %v1038_v35 = vld [vmem:[#allocation2 + $0x34] sm:$0xf0]  ;;  %v1037_v36 = vld [vmem:[#allocation2 + $0x34] sm:$0xf]  ;;  %v921_v37 = vld [vmem:[#allocation2 + $0x38] sm:$0xf0] }
 0x24b   :  { %529 = vmatpush.bf16.msra.mxu3 %v944_v19  ;;  %v920_v38 = vor.u32 %v1038_v35, %v919_v34  ;;  %v924_v39 = vor.u32 %v1037_v36, %v921_v37  ;;  %v911_v40 = vld [vmem:[#allocation2 + $0x20] sm:$0xf]  ;;  %v1036_v41 = vld [vmem:[#allocation2 + $0x24] sm:$0xf0]  ;;  %v1035_v42 = vld [vmem:[#allocation2 + $0x24] sm:$0xf] }
 0x24c   :  { %542 = vmatpush.bf16.msrb.mxu0 %v948_v20  ;;  %v913_v43 = vld [vmem:[#allocation2 + $0x28] sm:$0xf0]  ;;  %v912_v44 = vor.u32 %v1036_v41, %v911_v40  ;;  %v903_v46 = vld [vmem:[#allocation2 + $0x10] sm:$0xf]  ;;  %v1034_v47 = vld [vmem:[#allocation2 + $0x14] sm:$0xf0] }
 0x24d   :  { %v916_v45 = vor.u32 %v1035_v42, %v913_v43  ;;  %v1033_v48 = vld [vmem:[#allocation2 + $0x14] sm:$0xf]  ;;  %v905_v49 = vld [vmem:[#allocation2 + $0x18] sm:$0xf0]  ;;  %v904_v50 = vor.u32 %v1034_v47, %v903_v46  ;;  %v895_v52 = vld [vmem:[#allocation2] sm:$0xf] }
 0x24e   :  { %v908_v51 = vor.u32 %v1033_v48, %v905_v49  ;;  %v1032_v53 = vld [vmem:[#allocation2 + $0x4] sm:$0xf0]  ;;  %v1031_v54 = vld [vmem:[#allocation2 + $0x4] sm:$0xf]  ;;  %v897_v55 = vld [vmem:[#allocation2 + $0x8] sm:$0xf0] }
 0x24f   :  { %530 = vmatpush.bf16.msra.mxu3 %v936_v26  ;;  %v896_v56 = vor.u32 %v1032_v53, %v895_v52  ;;  %v900_v57 = vor.u32 %v1031_v54, %v897_v55  ;;  %vm616_vm2 = vcmask 1040384  }
 0x250   :  { %543 = vmatpush.bf16.msrb.mxu0 %v940_v27 }
 0x253   :  { %531 = vmatpush.bf16.msra.mxu3 %v928_v32 }
 0x254   :  { %544 = vmatpush.bf16.msrb.mxu0 %v932_v33 }
 0x257   :  { %532 = vmatpush.bf16.msra.mxu3 %v920_v38 }
 0x258   :  { %545 = vmatpush.bf16.msrb.mxu0 %v924_v39 }
 0x25b   :  { %533 = vmatpush.bf16.msra.mxu3 %v912_v44 }
 0x25c   :  { %546 = vmatpush.bf16.msrb.mxu0 %v916_v45 }
 0x25f   :  { %534 = vmatpush.bf16.msra.mxu3 %v904_v50  ;;  %v612_v50 = vld [vmem:[%s1546_s11] sm:$0x3] }
 0x260   :  { %547 = vmatpush.bf16.msrb.mxu0 %v908_v51 }
 0x263   :  { %535 = vmatpush.bf16.msra.mxu3 %v896_v56 }
 0x264   :  { %548 = vmatpush.bf16.msrb.mxu0 %v900_v57 }
 0x266   :  { %536 = vmatmul.bf16.vlgmr.msra.gmra.mxu3 %v447_v58 }
 0x267   :  { %549 = vmatmul.bf16.vlgmr.msrb.gmra.mxu0 %v447_v58  ;;  %v620_v58 = vld [vmem:[%s1547_s12] sm:$0x3] }
 0x2e4   :  { %v1505_v59 = vpop.f32.mrf.mxu0 }
 0x2e5   :  { %v560_v60 = vrot.slane %v1505_v59, 4  ;;  %v569_v61 = vmul.f32 %v1505_v59, %v1505_v59 }
 0x2e7   :  { %v561_v62 = vadd.f32 %v560_v60, %v1505_v59  ;;  %v576_v63 = vrot.slane %v569_v61, 4 }
 0x2e9   :  { %v562_v0 = vrot.slane %v561_v62, 2  ;;  %v577_v1 = vadd.f32 %v576_v63, %v569_v61  ;;  %v1511_v2 = vpop.f32.mrf.mxu3 }
 0x2ea   :  { %v554_v3 = vrot.slane %v1511_v2, 4  ;;  %v568_v4 = vmul.f32 %v1511_v2, %v1511_v2 }
 0x2eb   :  { %v563_v5 = vadd.f32 %v562_v0, %v561_v62  ;;  %v578_v6 = vrot.slane %v577_v1, 2 }
 0x2ec   :  { %v555_v7 = vadd.f32 %v554_v3, %v1511_v2  ;;  %v570_v8 = vrot.slane %v568_v4, 4  ;;  %v552_v9 = vpop.f32.mrf.mxu0 }
 0x2ed   :  { %v564_v10 = vrot.slane %v563_v5, 1  ;;  %v579_v11 = vadd.f32 %v578_v6, %v577_v1 }
 0x2ee   :  { %v556_v12 = vrot.slane %v555_v7, 2  ;;  %v571_v13 = vadd.f32 %v570_v8, %v568_v4 }
 0x2ef   :  { %v565_v14 = vadd.f32 %v564_v10, %v563_v5  ;;  %v580_v15 = vrot.slane %v579_v11, 1 }
 0x2f0   :  { %v557_v16 = vadd.f32 %v556_v12, %v555_v7  ;;  %v572_v17 = vrot.slane %v571_v13, 2 }
 0x2f1   :  { %v567_v18 = vmul.f32 %v565_v14, %v1472_v25  ;;  %v581_v19 = vadd.f32 %v580_v15, %v579_v11  ;;  %v539_v20 = vpop.f32.mrf.mxu3 }
 0x2f2   :  { %v558_v21 = vrot.slane %v557_v16, 1  ;;  %v573_v22 = vadd.f32 %v572_v17, %v571_v13 }
 0x2f3   :  { %v583_v23 = vmul.f32 %v581_v19, %v1472_v25  ;;  %v585_v24 = vmul.f32 %v567_v18, %v567_v18 }
 0x2f4   :  { %v559_v26 = vadd.f32 %v558_v21, %v557_v16  ;;  %v574_v27 = vrot.slane %v573_v22, 1 }
 0x2f5   :  { %v587_v28 = vsub.f32 %v583_v23, %v585_v24 }
 0x2f6   :  { %v566_v29 = vmul.f32 %v559_v26, %v1472_v25  ;;  %v575_v30 = vadd.f32 %v574_v27, %v573_v22 }
 0x2f7   :  { %v589_v31 = vmax.f32 %v587_v28, 0.0 }
 0x2f8   :  { %v582_v32 = vmul.f32 %v575_v30, %v1472_v25  ;;  %v584_v33 = vmul.f32 %v566_v29, %v566_v29 }
 0x2f9   :  { %v591_v34 = vadd.f32 1e-05, %v589_v31 }
 0x2fa   :  { %v586_v35 = vsub.f32 %v582_v32, %v584_v33 }
 0x2fb   :  { %1084 = vrsqrt.f32 %v591_v34  ;;  %vm608_vm14 = vweird.f32 %v591_v34 }
 0x2fc   :  { %v588_v36 = vmax.f32 %v586_v35, 0.0 }
 0x2fe   :  { %v590_v37 = vadd.f32 1e-05, %v588_v36 }
 0x300   :  { %1086 = vrsqrt.f32 %v590_v37  ;;  %vm598_vm1 = vweird.f32 %v590_v37 }
 0x301   :  { %v1085_v38 = vpop.eup %1084 }
 0x302   :  { %v603_v39 = vmul.f32 %v1085_v38, %v591_v34  ;;  %vm609_vm13 = vweird.f32 %v1085_v38 }
 0x303   :  { %vm610_vm15 = vmor %vm608_vm14, %vm609_vm13 }
 0x304   :  { %v604_v40 = vmul.f32 %v1085_v38, %v603_v39 }
 0x306   :  { %v1087_v41 = vpop.eup %1086  ;;  %v605_v42 = vmul.f32 0.5, %v604_v40 }
 0x307   :  { %v593_v43 = vmul.f32 %v1087_v41, %v590_v37  ;;  %vm599_vm0 = vweird.f32 %v1087_v41 }
 0x308   :  { %v606_v44 = vsub.f32 1.5, %v605_v42  ;;  %vm600_vm3 = vmor %vm598_vm1, %vm599_vm0 }
 0x309   :  { %v594_v45 = vmul.f32 %v1087_v41, %v593_v43 }
 0x30a   :  { %v607_v46 = vmul.f32 %v1085_v38, %v606_v44 }
 0x30b   :  { %v595_v47 = vmul.f32 0.5, %v594_v45 }
 0x30c   :  { %v611_v48 = vsel %vm610_vm15, %v1085_v38, %v607_v46 }
 0x30d   :  { %v596_v25 = vsub.f32 1.5, %v595_v47  ;;  %v615_v51 = vrot.slane %v611_v48, 7 }
 0x30f   :  { %v597_v49 = vmul.f32 %v1087_v41, %v596_v25 }
 0x311   :  { %v601_v52 = vsel %vm600_vm3, %v1087_v41, %v597_v49 }
 0x312   :  { %v617_v53 = vsel %vm616_vm2, %v601_v52, %v615_v51 }
 0x313   :  { %v619_v54 = vmul.f32 %v617_v53, %v612_v50 }
 0x315   :  { %v622_v55 = vperm.slane %v619_v54, 0  ;;  %v623_v56 = vperm.slane %v619_v54, 1 }
 0x317   :  { %v627_v57 = vmul.f32 %v623_v56, %v567_v18  ;;  %v626_v60 = vmul.f32 %v622_v55, %v566_v29  ;;  %v634_v0 = vmul.f32 %v622_v55, %v1511_v2  ;;  %v635_v1 = vmul.f32 %v623_v56, %v1505_v59 }
 0x319   :  { %v630_v61 = vrot.slane %v627_v57, 7 }
 0x31b   :  { %v631_v62 = vsel %vm616_vm2, %v626_v60, %v630_v61 }
 0x31c   :  { %v633_v63 = vsub.f32 %v620_v58, %v631_v62 }
 0x31e   :  { %v637_v3 = vperm.slane %v633_v63, 0  ;;  %v638_v4 = vperm.slane %v633_v63, 1 }
 0x320   :  { %v641_v5 = vadd.f32 %v637_v3, %v634_v0  ;;  %v642_v6 = vadd.f32 %v638_v4, %v635_v1 }
 0x322   :  { %v643_v7 = vmax.f32 %v641_v5, 0.0  ;;  %v644_v8 = vmax.f32 %v642_v6, 0.0 }
 0x323   :  { %1343 = dma.done.wait [#allocation4 + $0x1], 2048 }
 0x324   :  { %1344 = vsyncadd [#allocation4 + $0x1], 4294965248  ;;  %v1054_v9 = vld [vmem:[#allocation3 + $0x38] sm:$0xff]  ;;  %v1053_v11 = vld [vmem:[#allocation3 + $0x30] sm:$0xff]  ;;  %v649_v23 = vpack.c.bf16 %v643_v7, %v643_v7  ;;  %v650_v24 = vpack.c.bf16 %v644_v8, %v644_v8  ;;  %s1359_s1 = smov [#allocation17]   ;;  %s836_s18 = sshll.u32 %s1550_s15, 4  ;;  %s837_s18 = int_to_ptr.hbm [resolvable:$true] %s836_s18 }
 0x325   :  { %v1062_v10 = vld [vmem:[#allocation3 + $0x78] sm:$0xff]  ;;  %783 = vmatpush.bf16.msrb.mxu1 %v1054_v9  ;;  %v1061_v12 = vld [vmem:[#allocation3 + $0x70] sm:$0xff]  ;;  %v1052_v13 = vld [vmem:[#allocation3 + $0x28] sm:$0xff] }
 0x326   :  { %796 = vmatpush.bf16.msrb.mxu2 %v1062_v10  ;;  %v1060_v2 = vld [vmem:[#allocation3 + $0x68] sm:$0xff]  ;;  %v1051_v59 = vld [vmem:[#allocation3 + $0x20] sm:$0xff]  ;;  %v1050_v15 = vld [vmem:[#allocation3 + $0x18] sm:$0xff] }
 0x327   :  { %v1059_v14 = vld [vmem:[#allocation3 + $0x60] sm:$0xff]  ;;  %v1058_v16 = vld [vmem:[#allocation3 + $0x58] sm:$0xff]  ;;  %v1049_v17 = vld [vmem:[#allocation3 + $0x10] sm:$0xff] }
 0x328   :  { %v1057_v18 = vld [vmem:[#allocation3 + $0x50] sm:$0xff]  ;;  %v1048_v19 = vld [vmem:[#allocation3 + $0x8] sm:$0xff]  ;;  %v1047_v21 = vld [vmem:[#allocation3] sm:$0xff] }
 0x329   :  { %784 = vmatpush.bf16.msrb.mxu1 %v1053_v11  ;;  %v1056_v20 = vld [vmem:[#allocation3 + $0x48] sm:$0xff]  ;;  %v1055_v22 = vld [vmem:[#allocation3 + $0x40] sm:$0xff] }
 0x32a   :  { %797 = vmatpush.bf16.msrb.mxu2 %v1061_v12  ;;  %v1088_v26 = vld [vmem:[%s1549_s14] ss:$0 sm:$0xff]  ;;  %s834_s14 = sshll.u32 %s1359_s1, 4  ;;  %s835_s14 = int_to_ptr.vmem [resolvable:$true] %s834_s14 }
 0x32d   :  { %785 = vmatpush.bf16.msrb.mxu1 %v1052_v13 }
 0x32e   :  { %798 = vmatpush.bf16.msrb.mxu2 %v1060_v2 }
 0x331   :  { %786 = vmatpush.bf16.msrb.mxu1 %v1051_v59 }
 0x332   :  { %799 = vmatpush.bf16.msrb.mxu2 %v1059_v14 }
 0x335   :  { %787 = vmatpush.bf16.msrb.mxu1 %v1050_v15 }
 0x336   :  { %800 = vmatpush.bf16.msrb.mxu2 %v1058_v16 }
 0x339   :  { %788 = vmatpush.bf16.msrb.mxu1 %v1049_v17 }
 0x33a   :  { %801 = vmatpush.bf16.msrb.mxu2 %v1057_v18 }
 0x33d   :  { %789 = vmatpush.bf16.msrb.mxu1 %v1048_v19 }
 0x33e   :  { %802 = vmatpush.bf16.msrb.mxu2 %v1056_v20 }
 0x341   :  { %790 = vmatpush.bf16.msrb.mxu1 %v1047_v21 }
 0x342   :  { %803 = vmatpush.bf16.msrb.mxu2 %v1055_v22 }
 0x344   :  { %791 = vmatmul.bf16.vlgmr.msrb.gmra.mxu1 %v649_v23 }
 0x345   :  { %804 = vmatmul.bf16.vlgmr.msrb.gmra.mxu2 %v650_v24 }
 0x3c1   :  { %v792_v27 = vpop.f32.mrf.mxu1 }
 0x3c2   :  { %v793_v28 = vadd.f32 %v1088_v26, %v792_v27 }
 0x3c8   :  { %v805_v29 = vpop.f32.mrf.mxu2 }
 0x3c9   :  { %v806_v30 = vadd.f32 %v805_v29, %v793_v28  ;;  %v794_v31 = vpop.f32.mrf.mxu1 }
 0x3cb   :  { %v1021_v32 = vmul.f32 -1.442695, %v806_v30 }
 0x3cd   :  { %1089 = vpow2.f32 %v1021_v32 }
 0x3d0   :  { %v807_v33 = vpop.f32.mrf.mxu2 }
 0x3d3   :  { %v1090_v34 = vpop.eup %1089 }
 0x3d4   :  { %v812_v35 = vadd.f32 1.0, %v1090_v34 }
 0x3d6   :  { %1091 = vrcp.f32 %v812_v35  ;;  %v824_v39 = vand.u32 2147483648, %v812_v35  ;;  %v822_v41 = vand.u32 2147483647, %v812_v35  ;;  %vm818_vm5 = vweird.f32 %v812_v35 }
 0x3d8   :  { %v825_v43 = vor.u32 1.1754944e-38, %v824_v39  ;;  %vm823_vm7 = vcmp.eq.f32.partialorder %v822_v41, 8.507059e+37 }
 0x3dc   :  { %v1092_v36 = vpop.eup %1091 }
 0x3dd   :  { %v814_v37 = vmul.f32 %v1092_v36, %v812_v35  ;;  %vm819_vm4 = vweird.f32 %v1092_v36 }
 0x3de   :  { %vm820_vm6 = vmor %vm818_vm5, %vm819_vm4 }
 0x3df   :  { %v815_v38 = vsub.f32 1.0, %v814_v37 }
 0x3e1   :  { %v816_v40 = vmul.f32 %v1092_v36, %v815_v38 }
 0x3e3   :  { %v817_v42 = vadd.f32 %v1092_v36, %v816_v40 }
 0x3e5   :  { %v821_v44 = vsel %vm820_vm6, %v1092_v36, %v817_v42 }
 0x3e6   :  { %v826_v45 = vsel %vm823_vm7, %v825_v43, %v821_v44 }
 0x3e7   :  { %828 = vst [vmem:[#allocation17] sm:$0xff] %v826_v45 }
 0x3e8   :  { %839 = dma.vmem_to_hbm [thread:$0]  %s835_s14, 128, %s837_s18, [#allocation7]  }
 0x3e9   :  { %1345 = dma.done.wait [#allocation7], 128  }
 0x3ea   :  { %1346 = vsyncadd [#allocation7], 4294967168 }
 0x3eb   :  { %844 = vsyncpa [#allocation6], 1 }
 0x3ec   :  { %845 = vsyncpa [#allocation9], 1 }
 0x3ed   :  { %846 = vsyncpa [#allocation12], 1 }
 0x3ee   :  { %847 = vsyncpa [#allocation15], 1 }
 0x3ef   :  { %848 = vsyncpa [#allocation7], 1 }
 0x3f0   :  { %849 = vsyncmov [#allocation4] }
 0x3f3   :  { %s850_s15 = vpop.sfrf %849 }
 0x3f4   :  { %p1022_p0 = scmp.ne.s32.totalorder %s850_s15, 0 }
 0x3f6   :  { %854 = shalt.err (%p1022_p0)  }
 0x3f7   :  { %856 = vsyncmov [#allocation4 + $0x1] }
 0x3fa   :  { %s857_s19 = vpop.sfrf %856 }
 0x3fb   :  { %p1023_p1 = scmp.ne.s32.totalorder %s857_s19, 0 }
 0x3fd   :  { %861 = shalt.err (%p1023_p1)  }

</bundles_post_ra>
